<compile_context>
chip_gen: v5e
topology: v5e:2x2
jax: 0.10.0
libtpu: 0.0.40
codegen_flags: <defaults>
</compile_context>

<pallas_src>
import jax
import jax.numpy as jnp
from jax.experimental import pallas as pl
from jax.experimental.pallas import tpu as pltpu


def fused_conv_net_kernel(x4_ref, w1e_ref, b1_ref, w2d_ref, b2_ref,
                          wf1_ref, bf1_ref, wf2_ref, bf2_ref, o_ref):
    """Full forward for TB samples.  Rows are m-major: r = m*TB + b, channels on lanes.

    x4_ref : (TB*L4, 4)        x4[m*TB+b, q] = x[b, 4m+q]
    w1e_ref: (6, 4*C1)         conv1 taps for the 4 stride-4 phases, column order [p0|p2|p1|p3]
    b1_ref : (1, 2*C1)         conv1 bias tiled twice (matches [h1e | h1o] lanes)
    w2d_ref: (4*C1, 2*C2)      conv2 weight, taps on K, even/odd outputs block-shifted on N
    b2_ref : (1, C2)
    wf1_ref: (L4*C2, H)        fc1 weight permuted to the kernel's m-major flatten (bf16)
    bf1_ref: (1, H)
    wf2_ref: (H, NCP)          fc2 weight, zero-padded to lane-dense NCP lanes (bf16)
    bf2_ref: (1, NCP)
    o_ref  : (TB, NCP)
    """
    R = x4_ref.shape[0]                       # TB * L4
    TB = o_ref.shape[0]
    L4 = R // TB
    C1 = w1e_ref.shape[1] // 4
    C2 = b2_ref.shape[1]

    x4 = x4_ref[...]                                                  # (R, 4)
    row = jax.lax.broadcasted_iota(jnp.int32, (R, 1), 0)
    first = row < TB                                                  # m == 0
    last = row >= (L4 - 1) * TB                                       # m == L4 - 1

    # ---- conv1 for the 4 stride-4 phases: one K=6 matmul ----
    # neighbours x[4m-1] / x[4m+4]: rows +-TB away (in-register sublane roll),
    # zeroed across the padding boundaries of each sample.
    x_lo = jnp.where(first, 0.0, pltpu.roll(x4, shift=TB, axis=0)[:, 3:4])
    x_hi = jnp.where(last, 0.0, pltpu.roll(x4, shift=R - TB, axis=0)[:, 0:1])
    a6 = jnp.concatenate([x_lo, x4, x_hi], axis=1)                    # (R, 6): x[4m-1 .. 4m+4]
    y = jnp.dot(a6, w1e_ref[...], preferred_element_type=jnp.float32)  # (R, 4*C1) = [p0|p2|p1|p3]

    # ---- bias + relu + maxpool1 (k=2, s=2) in one 64-lane max ----
    # max([p0|p2], [p1|p3]) + b1 , relu  ->  [h1[.,2m] | h1[.,2m+1]]  (relu/bias commute w/ max)
    h1eo = jnp.maximum(jnp.maximum(y[:, :2 * C1], y[:, 2 * C1:]) + b1_ref[...], 0.0)  # (R, 2*C1)

    # ---- conv2 (+bias, relu) + maxpool2: one fused K=4*C1, N=2*C2 matmul ----
    h1_m1 = jnp.where(first, 0.0, pltpu.roll(h1eo, shift=TB, axis=0))      # h1 at m-1
    h1_p1 = jnp.where(last, 0.0, pltpu.roll(h1eo, shift=R - TB, axis=0))   # h1 at m+1
    # LHS lanes: [h1[2m-1] | h1[2m] | h1[2m+1] | h1[2m+2]]
    lhs2 = jnp.concatenate([h1_m1[:, C1:], h1eo, h1_p1[:, :C1]],
                           axis=1).astype(w2d_ref.dtype)                   # (R, 4*C1) bf16
    z = jnp.dot(lhs2, w2d_ref[...], preferred_element_type=jnp.float32)    # (R, 2*C2): [even|odd]
    h2 = jnp.maximum(jnp.maximum(z[:, :C2], z[:, C2:]) + b2_ref[...], 0.0)  # (R, C2) pooled

    # ---- flatten (b, m, c) -> (b, m*C2 + c): free lane-concat of contiguous row blocks ----
    f = jnp.concatenate([h2[m * TB:(m + 1) * TB, :] for m in range(L4)],
                        axis=1)                                            # (TB, L4*C2)

    # ---- fc1 (+relu) and fc2 (bf16 operands, f32 accumulate, lane-dense output) ----
    h = jnp.maximum(jnp.dot(f.astype(wf1_ref.dtype), wf1_ref[...],
                            preferred_element_type=jnp.float32) + bf1_ref[...], 0.0)
    o_ref[...] = jnp.dot(h.astype(wf2_ref.dtype), wf2_ref[...],
                         preferred_element_type=jnp.float32) + bf2_ref[...]


def _pick_tb(B):
    """Batch-tile size: fill the MXU M-dim, keep >=2 grid steps for v7x's 2 TensorCores."""
    b8 = -(-B // 8) * 8
    if b8 <= 128:
        return b8                         # small batch: one step
    if b8 <= 512:
        return -(-(b8 // 2) // 8) * 8     # two steps -> one per v7x TensorCore
    return 256                            # many steps of MXU-filling size (fine on v5e too)


def _const_spec(shape, single_buffer):
    """BlockSpec for a never-changing weight block; single-buffer it when it is big."""
    idx = lambda *_: (0,) * len(shape)
    if single_buffer and hasattr(pl, "Buffered"):
        try:
            return pl.BlockSpec(shape, idx, pipeline_mode=pl.Buffered(1))
        except TypeError:                 # older BlockSpec without pipeline_mode
            pass
    return pl.BlockSpec(shape, idx)


def conv_net_forward(x, params, compute_dtype=jnp.bfloat16):
    """ConvolutionalNetwork.forward.  x: (B, input_features) f32 -> (B, num_classes)."""
    w1, b1, w2, b2, wf1, bf1, wf2, bf2 = params    # PyTorch-layout parameters
    B, L = x.shape
    assert L % 4 == 0
    L4 = L // 4
    C1 = w1.shape[0]            # 32
    C2 = w2.shape[0]            # 64
    H = wf1.shape[0]            # 128
    num_classes = wf2.shape[0]
    NCP = max(128, -(-num_classes // 128) * 128)   # lane-dense padded output width

    # ---- batch blocking ----
    TB = _pick_tb(B)
    Bpad = -(-B // TB) * TB
    nb = Bpad // TB
    R = TB * L4
    xpad = jnp.pad(x, ((0, Bpad - B), (0, 0))) if Bpad != B else x
    # m-major rows within each batch tile (r = m*TB + b): tiny wrapper-side transpose of x
    # so the in-kernel flatten is a lane-concat of contiguous row blocks (no selector matmul).
    x4 = xpad.reshape(nb, TB, L4, 4).transpose(0, 2, 1, 3).reshape(nb * L4 * TB, 4)

    # ---- trace-time weight packing (weights only, no activation traffic) ----
    w1t = jnp.transpose(w1[:, 0, :], (1, 0))                               # (3, C1) [tap, cout]
    w1e = jnp.concatenate([jnp.pad(w1t, ((p, 3 - p), (0, 0))) for p in (0, 2, 1, 3)],
                          axis=1)                                          # (6, 4*C1) [p0|p2|p1|p3]
    b1d = jnp.tile(b1.reshape(1, C1), (1, 2))                              # (1, 2*C1)
    w2s = jnp.transpose(w2, (2, 1, 0)).reshape(3 * C1, C2)                 # (3*C1, C2) [tap*C1+c, o]
    w2d = jnp.concatenate([jnp.pad(w2s, ((0, C1), (0, 0))),                # even positions
                           jnp.pad(w2s, ((C1, 0), (0, 0)))],               # odd positions
                          axis=1).astype(compute_dtype)                    # (4*C1, 2*C2)
    wf1p = jnp.transpose(wf1.reshape(H, C2, L4), (2, 1, 0)).reshape(L4 * C2, H)
    wf1p = wf1p.astype(compute_dtype)                                      # (L4*C2, H) bf16
    wf2p = jnp.pad(jnp.transpose(wf2),
                   ((0, 0), (0, NCP - num_classes))).astype(compute_dtype)  # (H, NCP) bf16
    bf2p = jnp.pad(bf2.reshape(1, num_classes), ((0, 0), (0, NCP - num_classes)))

    weight_bytes = sum(int(a.size) * a.dtype.itemsize
                       for a in (w1e, b1d, w2d, b2, wf1p, bf1, wf2p, bf2p))
    single_buffer = weight_bytes > (2 << 20)       # only worth forcing when weights are big

    in_specs = [
        pl.BlockSpec((R, 4), lambda i: (i, 0)),                      # x4 (batch-blocked)
        _const_spec((6, 4 * C1), single_buffer),                     # w1e
        _const_spec((1, 2 * C1), single_buffer),                     # b1 (tiled)
        _const_spec((4 * C1, 2 * C2), single_buffer),                # w2d
        _const_spec((1, C2), single_buffer),                         # b2
        _const_spec((L4 * C2, H), single_buffer),                    # wf1 (permuted, bf16)
        _const_spec((1, H), single_buffer),                          # bf1
        _const_spec((H, NCP), single_buffer),                        # wf2.T (padded, bf16)
        _const_spec((1, NCP), single_buffer),                        # bf2 (padded)
    ]
    out_spec = pl.BlockSpec((TB, NCP), lambda i: (i, 0))

    # Advisory cost estimate so XLA schedules the call sensibly inside larger graphs.
    flops = 2 * Bpad * (L4 * (6 * 4 * C1 + 4 * C1 * 2 * C2 + C2 * H) + H * NCP)
    bytes_accessed = int(x4.size) * 4 + weight_bytes + Bpad * NCP * 4
    cost = pl.CostEstimate(flops=int(flops), transcendentals=0,
                           bytes_accessed=int(bytes_accessed))

    # Raise the scoped-VMEM limit only when the working set actually needs it.
    act_bytes = R * max(4 * C1, 2 * C2, 128) * 4
    vmem_est = 2 * (R * 128 * 4 + TB * NCP * 4) + 2 * weight_bytes + 8 * act_bytes
    cp_kwargs = dict(dimension_semantics=("parallel",))
    if vmem_est > 24 * 1024 * 1024:
        cp_kwargs["vmem_limit_bytes"] = int(min(vmem_est + (8 << 20), 96 * 1024 * 1024))

    out = pl.pallas_call(
        fused_conv_net_kernel,
        out_shape=jax.ShapeDtypeStruct((Bpad, NCP), jnp.float32),
        grid=(nb,),
        in_specs=in_specs,
        out_specs=out_spec,
        compiler_params=pltpu.CompilerParams(**cp_kwargs),
        cost_estimate=cost,
    )(x4, w1e, b1d, w2d, b2.reshape(1, C2), wf1p, bf1.reshape(1, H), wf2p, bf2p)
    return out[:B, :num_classes]


def ref_forward(x, params):
    """Pure-JAX reference reproducing the PyTorch forward semantics (high precision)."""
    w1, b1, w2, b2, wf1, bf1, wf2, bf2 = params
    B, L = x.shape
    hp = jax.lax.Precision.HIGHEST
    xp = jnp.pad(x, ((0, 0), (1, 1)))
    y = b1[None, :, None] + sum(w1[None, :, 0, k, None] * xp[:, None, k:k + L]
                                for k in range(3))
    y = jnp.maximum(y, 0.0)
    y = jnp.max(y.reshape(B, w1.shape[0], L // 2, 2), axis=-1)
    yp = jnp.pad(y, ((0, 0), (0, 0), (1, 1)))
    z = b2[None, :, None] + sum(jnp.einsum('oi,bil->bol', w2[:, :, k],
                                           yp[:, :, k:k + L // 2], precision=hp)
                                for k in range(3))
    z = jnp.maximum(z, 0.0)
    z = jnp.max(z.reshape(B, w2.shape[0], L // 4, 2), axis=-1)
    f = z.reshape(B, -1)
    h = jnp.maximum(jnp.dot(f, wf1.T, precision=hp) + bf1, 0.0)
    return jnp.dot(h, wf2.T, precision=hp) + bf2


if __name__ == "__main__":
    B, L, num_classes = 2, 16, 3          # input_features = 16 -> conv_output_size = 4
    L4 = L // 4
    key = jax.random.PRNGKey(0)
    ks = jax.random.split(key, 9)
    w1 = 0.2 * jax.random.normal(ks[0], (32, 1, 3), jnp.float32)
    b1 = 0.1 * jax.random.normal(ks[1], (32,), jnp.float32)
    w2 = 0.1 * jax.random.normal(ks[2], (64, 32, 3), jnp.float32)
    b2 = 0.1 * jax.random.normal(ks[3], (64,), jnp.float32)
    wf1 = 0.05 * jax.random.normal(ks[4], (128, 64 * L4), jnp.float32)
    bf1 = 0.1 * jax.random.normal(ks[5], (128,), jnp.float32)
    wf2 = 0.1 * jax.random.normal(ks[6], (num_classes, 128), jnp.float32)
    bf2 = 0.1 * jax.random.normal(ks[7], (num_classes,), jnp.float32)
    x = jax.random.normal(ks[8], (B, L), jnp.float32)
    params = (w1, b1, w2, b2, wf1, bf1, wf2, bf2)

    out = jax.block_until_ready(jax.jit(conv_net_forward)(x, params))
    ref = jax.block_until_ready(ref_forward(x, params))
    assert out.shape == (B, num_classes), out.shape
    # tolerance accounts for bf16 MXU operands (f32 accumulate) vs the HIGHEST-precision ref
    if not jnp.allclose(out, ref, atol=2e-2, rtol=2e-2):
        raise AssertionError(
            f"kernel/reference mismatch (max abs diff {jnp.max(jnp.abs(out - ref))}):\n"
            f"{out}\nvs\n{ref}")
    print("KERNEL_OK")
</pallas_src>

<mosaic_0001>
module attributes {stable_mosaic.version = 11 : i64} {
  func.func @fused_conv_net_kernel(%arg0: i32, %arg1: memref<32x4xf32, #tpu.memory_space<vmem>>, %arg2: memref<6x128xf32, #tpu.memory_space<vmem>>, %arg3: memref<1x64xf32, #tpu.memory_space<vmem>>, %arg4: memref<128x128xbf16, #tpu.memory_space<vmem>>, %arg5: memref<1x64xf32, #tpu.memory_space<vmem>>, %arg6: memref<256x128xbf16, #tpu.memory_space<vmem>>, %arg7: memref<1x128xf32, #tpu.memory_space<vmem>>, %arg8: memref<128x128xbf16, #tpu.memory_space<vmem>>, %arg9: memref<1x128xf32, #tpu.memory_space<vmem>>, %arg10: memref<8x128xf32, #tpu.memory_space<vmem>>) attributes {dimension_semantics = [#tpu.dimension_semantics<parallel>], iteration_bounds = array<i64: 1>, scalar_prefetch = 0 : i64, scratch_operands = 0 : i64, tpu.core_type = #tpu.core_type<tc>, window_params = [{transform_indices = @transform_0, window_bounds = array<i64: 32, 4>}, {pipeline_mode = #tpu.pipeline_mode<synchronous>, transform_indices = @transform_1, window_bounds = array<i64: 6, 128>}, {pipeline_mode = #tpu.pipeline_mode<synchronous>, transform_indices = @transform_2, window_bounds = array<i64: 1, 64>}, {pipeline_mode = #tpu.pipeline_mode<synchronous>, transform_indices = @transform_3, window_bounds = array<i64: 128, 128>}, {pipeline_mode = #tpu.pipeline_mode<synchronous>, transform_indices = @transform_4, window_bounds = array<i64: 1, 64>}, {pipeline_mode = #tpu.pipeline_mode<synchronous>, transform_indices = @transform_5, window_bounds = array<i64: 256, 128>}, {pipeline_mode = #tpu.pipeline_mode<synchronous>, transform_indices = @transform_6, window_bounds = array<i64: 1, 128>}, {pipeline_mode = #tpu.pipeline_mode<synchronous>, transform_indices = @transform_7, window_bounds = array<i64: 128, 128>}, {pipeline_mode = #tpu.pipeline_mode<synchronous>, transform_indices = @transform_8, window_bounds = array<i64: 1, 128>}, {transform_indices = @transform_9, window_bounds = array<i64: 8, 128>}]} {
    %c0 = arith.constant 0 : index
    %c0_0 = arith.constant 0 : index
    %0 = vector.load %arg1[%c0, %c0_0] : memref<32x4xf32, #tpu.memory_space<vmem>>, vector<32x4xf32>
    %1 = tpu.iota {dimensions = array<i32: 0>} : vector<32x1xi32>
    %c8_i32 = arith.constant 8 : i32
    %2 = vector.broadcast %c8_i32 : i32 to vector<32x1xi32>
    %3 = arith.cmpi slt, %1, %2 : vector<32x1xi32>
    %c24_i32 = arith.constant 24 : i32
    %4 = vector.broadcast %c24_i32 : i32 to vector<32x1xi32>
    %5 = arith.cmpi sge, %1, %4 : vector<32x1xi32>
    %c8_i32_1 = arith.constant 8 : i32
    %6 = tpu.dynamic_rotate %0 by %c8_i32_1 dim 0 : vector<32x4xf32>, i32 -> vector<32x4xf32>
    %7 = vector.extract_strided_slice %6 {offsets = [0, 3], sizes = [32, 1], strides = [1, 1]} : vector<32x4xf32> to vector<32x1xf32>
    %cst = arith.constant 0.000000e+00 : f32
    %8 = vector.broadcast %cst : f32 to vector<32x1xf32>
    %9 = arith.select %3, %8, %7 : vector<32x1xi1>, vector<32x1xf32>
    %c24_i32_2 = arith.constant 24 : i32
    %10 = tpu.dynamic_rotate %0 by %c24_i32_2 dim 0 : vector<32x4xf32>, i32 -> vector<32x4xf32>
    %11 = vector.extract_strided_slice %10 {offsets = [0, 0], sizes = [32, 1], strides = [1, 1]} : vector<32x4xf32> to vector<32x1xf32>
    %cst_3 = arith.constant 0.000000e+00 : f32
    %12 = vector.broadcast %cst_3 : f32 to vector<32x1xf32>
    %13 = arith.select %5, %12, %11 : vector<32x1xi1>, vector<32x1xf32>
    %14 = tpu.concatenate %9, %0, %13 in 1 : vector<32x1xf32>, vector<32x4xf32>, vector<32x1xf32> -> vector<32x6xf32>
    %c0_4 = arith.constant 0 : index
    %c0_5 = arith.constant 0 : index
    %15 = vector.load %arg2[%c0_4, %c0_5] : memref<6x128xf32, #tpu.memory_space<vmem>>, vector<6x128xf32>
    %cst_6 = arith.constant dense<0.000000e+00> : vector<32x128xf32>
    %16 = tpu.matmul %14, %15, %cst_6 {dimension_numbers = #tpu.dot_dimension_numbers<[1], [0], [0], [1], [0, 0, 1, 1], [], []>} : vector<32x6xf32>, vector<6x128xf32>, vector<32x128xf32> -> vector<32x128xf32>
    %17 = vector.extract_strided_slice %16 {offsets = [0, 0], sizes = [32, 64], strides = [1, 1]} : vector<32x128xf32> to vector<32x64xf32>
    %18 = vector.extract_strided_slice %16 {offsets = [0, 64], sizes = [32, 64], strides = [1, 1]} : vector<32x128xf32> to vector<32x64xf32>
    %19 = arith.maximumf %17, %18 : vector<32x64xf32>
    %c0_7 = arith.constant 0 : index
    %c0_8 = arith.constant 0 : index
    %20 = vector.load %arg3[%c0_7, %c0_8] : memref<1x64xf32, #tpu.memory_space<vmem>>, vector<1x64xf32>
    %21 = vector.broadcast %20 : vector<1x64xf32> to vector<32x64xf32>
    %22 = arith.addf %19, %21 : vector<32x64xf32>
    %cst_9 = arith.constant 0.000000e+00 : f32
    %23 = vector.broadcast %cst_9 : f32 to vector<32x64xf32>
    %24 = arith.maximumf %22, %23 : vector<32x64xf32>
    %c8_i32_10 = arith.constant 8 : i32
    %25 = tpu.dynamic_rotate %24 by %c8_i32_10 dim 0 : vector<32x64xf32>, i32 -> vector<32x64xf32>
    %cst_11 = arith.constant 0.000000e+00 : f32
    %26 = vector.shape_cast %3 : vector<32x1xi1> to vector<32x1xi1>
    %27 = vector.broadcast %26 : vector<32x1xi1> to vector<32x64xi1>
    %28 = vector.broadcast %cst_11 : f32 to vector<32x64xf32>
    %29 = arith.select %27, %28, %25 : vector<32x64xi1>, vector<32x64xf32>
    %c24_i32_12 = arith.constant 24 : i32
    %30 = tpu.dynamic_rotate %24 by %c24_i32_12 dim 0 : vector<32x64xf32>, i32 -> vector<32x64xf32>
    %cst_13 = arith.constant 0.000000e+00 : f32
    %31 = vector.shape_cast %5 : vector<32x1xi1> to vector<32x1xi1>
    %32 = vector.broadcast %31 : vector<32x1xi1> to vector<32x64xi1>
    %33 = vector.broadcast %cst_13 : f32 to vector<32x64xf32>
    %34 = arith.select %32, %33, %30 : vector<32x64xi1>, vector<32x64xf32>
    %35 = vector.extract_strided_slice %29 {offsets = [0, 32], sizes = [32, 32], strides = [1, 1]} : vector<32x64xf32> to vector<32x32xf32>
    %36 = vector.extract_strided_slice %34 {offsets = [0, 0], sizes = [32, 32], strides = [1, 1]} : vector<32x64xf32> to vector<32x32xf32>
    %37 = tpu.concatenate %35, %24, %36 in 1 : vector<32x32xf32>, vector<32x64xf32>, vector<32x32xf32> -> vector<32x128xf32>
    %38 = arith.truncf %37 : vector<32x128xf32> to vector<32x128xbf16>
    %c0_14 = arith.constant 0 : index
    %c0_15 = arith.constant 0 : index
    %39 = vector.load %arg4[%c0_14, %c0_15] : memref<128x128xbf16, #tpu.memory_space<vmem>>, vector<128x128xbf16>
    %cst_16 = arith.constant dense<0.000000e+00> : vector<32x128xf32>
    %40 = tpu.matmul %38, %39, %cst_16 {dimension_numbers = #tpu.dot_dimension_numbers<[1], [0], [0], [1], [0, 0, 1, 1], [], []>} : vector<32x128xbf16>, vector<128x128xbf16>, vector<32x128xf32> -> vector<32x128xf32>
    %41 = vector.extract_strided_slice %40 {offsets = [0, 0], sizes = [32, 64], strides = [1, 1]} : vector<32x128xf32> to vector<32x64xf32>
    %42 = vector.extract_strided_slice %40 {offsets = [0, 64], sizes = [32, 64], strides = [1, 1]} : vector<32x128xf32> to vector<32x64xf32>
    %43 = arith.maximumf %41, %42 : vector<32x64xf32>
    %c0_17 = arith.constant 0 : index
    %c0_18 = arith.constant 0 : index
    %44 = vector.load %arg5[%c0_17, %c0_18] : memref<1x64xf32, #tpu.memory_space<vmem>>, vector<1x64xf32>
    %45 = vector.broadcast %44 : vector<1x64xf32> to vector<32x64xf32>
    %46 = arith.addf %43, %45 : vector<32x64xf32>
    %cst_19 = arith.constant 0.000000e+00 : f32
    %47 = vector.broadcast %cst_19 : f32 to vector<32x64xf32>
    %48 = arith.maximumf %46, %47 : vector<32x64xf32>
    %49 = vector.extract_strided_slice %48 {offsets = [0, 0], sizes = [8, 64], strides = [1, 1]} : vector<32x64xf32> to vector<8x64xf32>
    %50 = vector.extract_strided_slice %48 {offsets = [8, 0], sizes = [8, 64], strides = [1, 1]} : vector<32x64xf32> to vector<8x64xf32>
    %51 = vector.extract_strided_slice %48 {offsets = [16, 0], sizes = [8, 64], strides = [1, 1]} : vector<32x64xf32> to vector<8x64xf32>
    %52 = vector.extract_strided_slice %48 {offsets = [24, 0], sizes = [8, 64], strides = [1, 1]} : vector<32x64xf32> to vector<8x64xf32>
    %53 = tpu.concatenate %49, %50, %51, %52 in 1 : vector<8x64xf32>, vector<8x64xf32>, vector<8x64xf32>, vector<8x64xf32> -> vector<8x256xf32>
    %54 = arith.truncf %53 : vector<8x256xf32> to vector<8x256xbf16>
    %c0_20 = arith.constant 0 : index
    %c0_21 = arith.constant 0 : index
    %55 = vector.load %arg6[%c0_20, %c0_21] : memref<256x128xbf16, #tpu.memory_space<vmem>>, vector<256x128xbf16>
    %cst_22 = arith.constant dense<0.000000e+00> : vector<8x128xf32>
    %56 = tpu.matmul %54, %55, %cst_22 {dimension_numbers = #tpu.dot_dimension_numbers<[1], [0], [0], [1], [0, 0, 1, 1], [], []>} : vector<8x256xbf16>, vector<256x128xbf16>, vector<8x128xf32> -> vector<8x128xf32>
    %c0_23 = arith.constant 0 : index
    %c0_24 = arith.constant 0 : index
    %57 = vector.load %arg7[%c0_23, %c0_24] : memref<1x128xf32, #tpu.memory_space<vmem>>, vector<1x128xf32>
    %58 = vector.broadcast %57 : vector<1x128xf32> to vector<8x128xf32>
    %59 = arith.addf %56, %58 : vector<8x128xf32>
    %cst_25 = arith.constant 0.000000e+00 : f32
    %60 = vector.broadcast %cst_25 : f32 to vector<8x128xf32>
    %61 = arith.maximumf %59, %60 : vector<8x128xf32>
    %62 = arith.truncf %61 : vector<8x128xf32> to vector<8x128xbf16>
    %c0_26 = arith.constant 0 : index
    %c0_27 = arith.constant 0 : index
    %63 = vector.load %arg8[%c0_26, %c0_27] : memref<128x128xbf16, #tpu.memory_space<vmem>>, vector<128x128xbf16>
    %cst_28 = arith.constant dense<0.000000e+00> : vector<8x128xf32>
    %64 = tpu.matmul %62, %63, %cst_28 {dimension_numbers = #tpu.dot_dimension_numbers<[1], [0], [0], [1], [0, 0, 1, 1], [], []>} : vector<8x128xbf16>, vector<128x128xbf16>, vector<8x128xf32> -> vector<8x128xf32>
    %c0_29 = arith.constant 0 : index
    %c0_30 = arith.constant 0 : index
    %65 = vector.load %arg9[%c0_29, %c0_30] : memref<1x128xf32, #tpu.memory_space<vmem>>, vector<1x128xf32>
    %66 = vector.broadcast %65 : vector<1x128xf32> to vector<8x128xf32>
    %67 = arith.addf %64, %66 : vector<8x128xf32>
    %c0_31 = arith.constant 0 : index
    %c0_32 = arith.constant 0 : index
    %68 = vector.load %arg10[%c0_31, %c0_32] : memref<8x128xf32, #tpu.memory_space<vmem>>, vector<8x128xf32>
    tpu.vector_store %arg10[%c0_31, %c0_32], %67 {strides = array<i32>} : memref<8x128xf32, #tpu.memory_space<vmem>>, vector<8x128xf32>,
    return
  }
  func.func @transform_0(%arg0: i32) -> (i32, i32) {
    %c0_i32 = arith.constant 0 : i32
    %c0_i32_0 = arith.constant 0 : i32
    return %arg0, %c0_i32 : i32, i32
  }
  func.func @transform_1(%arg0: i32) -> (i32, i32) {
    %c0_i32 = arith.constant 0 : i32
    %c0_i32_0 = arith.constant 0 : i32
    %c0_i32_1 = arith.constant 0 : i32
    return %c0_i32, %c0_i32_0 : i32, i32
  }
  func.func @transform_2(%arg0: i32) -> (i32, i32) {
    %c0_i32 = arith.constant 0 : i32
    %c0_i32_0 = arith.constant 0 : i32
    %c0_i32_1 = arith.constant 0 : i32
    return %c0_i32, %c0_i32_0 : i32, i32
  }
  func.func @transform_3(%arg0: i32) -> (i32, i32) {
    %c0_i32 = arith.constant 0 : i32
    %c0_i32_0 = arith.constant 0 : i32
    %c0_i32_1 = arith.constant 0 : i32
    return %c0_i32, %c0_i32_0 : i32, i32
  }
  func.func @transform_4(%arg0: i32) -> (i32, i32) {
    %c0_i32 = arith.constant 0 : i32
    %c0_i32_0 = arith.constant 0 : i32
    %c0_i32_1 = arith.constant 0 : i32
    return %c0_i32, %c0_i32_0 : i32, i32
  }
  func.func @transform_5(%arg0: i32) -> (i32, i32) {
    %c0_i32 = arith.constant 0 : i32
    %c0_i32_0 = arith.constant 0 : i32
    %c0_i32_1 = arith.constant 0 : i32
    return %c0_i32, %c0_i32_0 : i32, i32
  }
  func.func @transform_6(%arg0: i32) -> (i32, i32) {
    %c0_i32 = arith.constant 0 : i32
    %c0_i32_0 = arith.constant 0 : i32
    %c0_i32_1 = arith.constant 0 : i32
    return %c0_i32, %c0_i32_0 : i32, i32
  }
  func.func @transform_7(%arg0: i32) -> (i32, i32) {
    %c0_i32 = arith.constant 0 : i32
    %c0_i32_0 = arith.constant 0 : i32
    %c0_i32_1 = arith.constant 0 : i32
    return %c0_i32, %c0_i32_0 : i32, i32
  }
  func.func @transform_8(%arg0: i32) -> (i32, i32) {
    %c0_i32 = arith.constant 0 : i32
    %c0_i32_0 = arith.constant 0 : i32
    %c0_i32_1 = arith.constant 0 : i32
    return %c0_i32, %c0_i32_0 : i32, i32
  }
  func.func @transform_9(%arg0: i32) -> (i32, i32) {
    %c0_i32 = arith.constant 0 : i32
    %c0_i32_0 = arith.constant 0 : i32
    return %arg0, %c0_i32 : i32, i32
  }
}

</mosaic_0001>

<bundles_post_ra>
// kernel: conv_net_forward.1
= control target key start
LH: loop header
LB: loop body
LE: loop exit
PB: predicated region body
PF: predicated region fallthrough
CT: control target
= control target key end

     0   :  { %v863_v0 = vmov 0.0   ;;  %s864_s30 = smov 125   ;;  %s865_s12 = smov 5   ;;  %vm129_vm0 = vcmask 1045504   ;;  %vm105_vm1 = vcmask 7168   ;;  %vm110_vm2 = vcmask 39936   ;;  %s1086_s0 = inlined_call_operand.vmem [shape: f32[32,4], index: 0, kind: input, shape index: {}]   ;;  %s1087_s1 = inlined_call_operand.vmem [shape: f32[6,128], index: 1, kind: input, shape index: {}]   ;;  %s1088_s2 = inlined_call_operand.vmem [shape: f32[1,64], index: 2, kind: input, shape index: {}]   ;;  %s1089_s3 = inlined_call_operand.vmem [shape: bf16[128,128], index: 3, kind: input, shape index: {}]   ;;  %s1090_s4 = inlined_call_operand.vmem [shape: f32[1,64], index: 4, kind: input, shape index: {}]   ;;  %s1091_s6 = inlined_call_operand.vmem [shape: f32[1,128], index: 6, kind: input, shape index: {}]   ;;  %s1092_s5 = inlined_call_operand.vmem [shape: bf16[256,128], index: 5, kind: input, shape index: {}]   ;;  %s1093_s7 = inlined_call_operand.vmem [shape: bf16[128,128], index: 7, kind: input, shape index: {}]   ;;  %s1094_s8 = inlined_call_operand.vmem [shape: f32[1,128], index: 8, kind: input, shape index: {}]   ;;  %s1095_s9 = inlined_call_operand.vmem [shape: f32[8,128], index: 9, kind: output, shape index: {}]  }
   0x1   :  { %61 = vrot.lane.b32.xlu0 %v863_v0, %s864_s30  ;;  %v33_v1 = vld [vmem:[%s1086_s0 + $0x8] sm:$0xff]  ;;  %s866_s13 = smov 1   ;;  %v32_v2 = vld [vmem:[%s1086_s0] sm:$0xff]  ;;  %v34_v3 = vld [vmem:[%s1086_s0 + $0x10] sm:$0xff]  ;;  %vm116_vm3 = vcmask 48128   ;;  %s868_s25 = smov 96  }
   0x2   :  { %93 = vrot.lane.b32.xlu1 %v33_v1, %s865_s12  ;;  %79 = vrot.lane.b32.xlu2 %v33_v1, %s866_s13  ;;  %v35_v4 = vld [vmem:[%s1086_s0 + $0x18] sm:$0xff]  ;;  %v115_v5 = vld [vmem:[%s1087_s1] sm:$0x3f]  ;;  %s867_s0 = smov 64   ;;  %vm266_vm4 = vcmask 261120   ;;  %vm271_vm5 = vcmask 785408  }
   0x3   :  { %652 = vmatpush.msk.msra.mxu0 %vm129_vm0, %v115_v5  ;;  %v859_v31 = vld [vmem:[%s1088_s2] ss:$0 sm:$0xff]  ;;  %v792_v33 = vld [vmem:[%s1089_s3 + $0x38] sm:$0xff]  ;;  %s869_s2 = smov 32   ;;  %v791_v53 = vld [vmem:[%s1089_s3 + $0x30] sm:$0xff]  ;;  %vm401_vm6 = vcmask 523264  }
   0x4   :  { %342 = vmatpush.bf16.msra.mxu1 %v792_v33  ;;  %v790_v54 = vld [vmem:[%s1089_s3 + $0x28] sm:$0xff]  ;;  %v789_v55 = vld [vmem:[%s1089_s3 + $0x20] sm:$0xff]  ;;  %v788_v56 = vld [vmem:[%s1089_s3 + $0x18] sm:$0xff] }
   0x5   :  { %v787_v57 = vld [vmem:[%s1089_s3 + $0x10] sm:$0xff]  ;;  %v786_v58 = vld [vmem:[%s1089_s3 + $0x8] sm:$0xff]  ;;  %v785_v59 = vld [vmem:[%s1089_s3] sm:$0xff] }
   0x6   :  { %v806_v33 = vld [vmem:[%s1092_s5 + $0x68] sm:$0xff] }
   0x8   :  { %343 = vmatpush.bf16.msra.mxu1 %v791_v53  ;;  %v801_v53 = vld [vmem:[%s1092_s5 + $0x40] sm:$0xff] }
   0x9   :  { %77 = vrot.lane.b32.xlu0 %v32_v2, %s866_s13 }
   0xa   :  { %63 = vrot.lane.b32.xlu1 %v32_v2, %s864_s30  ;;  %95 = vrot.lane.b32.xlu2 %v34_v3, %s865_s12 }
   0xc   :  { %344 = vmatpush.bf16.msra.mxu1 %v790_v54  ;;  %v816_v54 = vld [vmem:[%s1093_s7 + $0x38] sm:$0xff] }
   0xd   :  { %634 = vmatpush.bf16.msrb.mxu0 %v816_v54 }
  0x10   :  { %345 = vmatpush.bf16.msra.mxu1 %v789_v55  ;;  %v815_v55 = vld [vmem:[%s1093_s7 + $0x30] sm:$0xff] }
  0x11   :  { %65 = vrot.lane.b32.xlu0 %v33_v1, %s864_s30  ;;  %635 = vmatpush.bf16.msrb.mxu0 %v815_v55 }
  0x12   :  { %81 = vrot.lane.b32.xlu1 %v34_v3, %s866_s13  ;;  %97 = vrot.lane.b32.xlu2 %v35_v4, %s865_s12 }
  0x14   :  { %346 = vmatpush.bf16.msra.mxu1 %v788_v56  ;;  %v814_v56 = vld [vmem:[%s1093_s7 + $0x28] sm:$0xff] }
  0x15   :  { %636 = vmatpush.bf16.msrb.mxu0 %v814_v56 }
  0x18   :  { %347 = vmatpush.bf16.msra.mxu1 %v787_v57  ;;  %v813_v57 = vld [vmem:[%s1093_s7 + $0x20] sm:$0xff] }
  0x19   :  { %67 = vrot.lane.b32.xlu0 %v34_v3, %s864_s30  ;;  %637 = vmatpush.bf16.msrb.mxu0 %v813_v57 }
  0x1a   :  { %83 = vrot.lane.b32.xlu1 %v35_v4, %s866_s13  ;;  %99 = vrot.lane.b32.xlu2 %v863_v0, %s865_s12 }
  0x1c   :  { %348 = vmatpush.bf16.msra.mxu1 %v786_v58  ;;  %v812_v58 = vld [vmem:[%s1093_s7 + $0x18] sm:$0xff] }
  0x1d   :  { %638 = vmatpush.bf16.msrb.mxu0 %v812_v58 }
  0x20   :  { %349 = vmatpush.bf16.msra.mxu1 %v785_v59 }
  0x5c   :  { %v80_v8 = vpop.permute.xlu2 %79 }
  0x64   :  { %v96_v13 = vpop.permute.xlu2 %95 }
  0x6c   :  { %v98_v18 = vpop.permute.xlu2 %97 }
  0x73   :  { %v62_v6 = vpop.permute.xlu0 %61 }
  0x74   :  { %v94_v7 = vpop.permute.xlu1 %93  ;;  %v100_v24 = vpop.permute.xlu2 %99 }
  0x7b   :  { %v78_v9 = vpop.permute.xlu0 %77 }
  0x7c   :  { %v106_v10 = vsel %vm105_vm1, %v62_v6, %v78_v9  ;;  %v64_v11 = vpop.permute.xlu1 %63 }
  0x7d   :  { %v111_v12 = vsel %vm110_vm2, %v106_v10, %v94_v7  ;;  %v107_v14 = vsel %vm105_vm1, %v64_v11, %v80_v8 }
  0x7e   :  { %653 = vmatmul.msk.f32.vlgmr.msra.gmra.mxu0 %vm116_vm3, %v111_v12  ;;  %v112_v17 = vsel %vm110_vm2, %v107_v14, %v96_v13 }
  0x83   :  { %v66_v15 = vpop.permute.xlu0 %65 }
  0x84   :  { %v82_v16 = vpop.permute.xlu1 %81 }
  0x85   :  { %v108_v19 = vsel %vm105_vm1, %v66_v15, %v82_v16 }
  0x86   :  { %654 = vmatmul.msk.f32.gmra.mxu0 %vm116_vm3, %v112_v17  ;;  %v113_v20 = vsel %vm110_vm2, %v108_v19, %v98_v18 }
  0x8b   :  { %v68_v22 = vpop.permute.xlu0 %67 }
  0x8c   :  { %v84_v21 = vpop.permute.xlu1 %83 }
  0x8d   :  { %v109_v23 = vsel %vm105_vm1, %v68_v22, %v84_v21 }
  0x8e   :  { %655 = vmatmul.msk.f32.gmra.mxu0 %vm116_vm3, %v113_v20  ;;  %v114_v25 = vsel %vm110_vm2, %v109_v23, %v100_v24 }
  0x96   :  { %656 = vmatmul.msk.f32.gmra.mxu0 %vm116_vm3, %v114_v25 }
  0xfb   :  { %v150_v26 = vpop.f32.mrf.mxu0 }
  0xfc   :  { %166 = vrot.lane.b32.xlu0 %v150_v26, %s867_s0 }
 0x103   :  { %v153_v27 = vpop.f32.mrf.mxu0 }
 0x104   :  { %168 = vrot.lane.b32.xlu1 %v153_v27, %s867_s0 }
 0x10b   :  { %v156_v28 = vpop.f32.mrf.mxu0 }
 0x10c   :  { %170 = vrot.lane.b32.xlu2 %v156_v28, %s867_s0 }
 0x113   :  { %v159_v29 = vpop.f32.mrf.mxu0 }
 0x114   :  { %172 = vrot.lane.b32.xlu0 %v159_v29, %s867_s0 }
 0x166   :  { %v171_v34 = vpop.permute.xlu2 %170 }
 0x167   :  { %v180_v36 = vmax.f32 %v156_v28, %v171_v34  ;;  %v800_v28 = vld [vmem:[%s1092_s5 + $0x38] sm:$0xff]  ;;  %v797_v34 = vld [vmem:[%s1092_s5 + $0x20] sm:$0xff] }
 0x168   :  { %538 = vmatpush.bf16.msra.mxu2 %v800_v28 }
 0x169   :  { %v188_v40 = vadd.f32 %v859_v31, %v180_v36 }
 0x16b   :  { %v192_v43 = vmax.f32 %v188_v40, 0.0 }
 0x16e   :  { %v167_v30 = vpop.permute.xlu0 %166 }
 0x16f   :  { %v178_v32 = vmax.f32 %v150_v26, %v167_v30  ;;  %v799_v30 = vld [vmem:[%s1092_s5 + $0x30] sm:$0xff] }
 0x170   :  { %539 = vmatpush.bf16.msra.mxu2 %v799_v30 }
 0x171   :  { %v186_v35 = vadd.f32 %v859_v31, %v178_v32  ;;  %v798_v32 = vld [vmem:[%s1092_s5 + $0x28] sm:$0xff] }
 0x173   :  { %v190_v37 = vmax.f32 %v186_v35, 0.0  ;;  %v805_v35 = vld [vmem:[%s1092_s5 + $0x60] sm:$0xff] }
 0x174   :  { %540 = vmatpush.bf16.msra.mxu2 %v798_v32 }
 0x175   :  { %v824_v38 = vpack.i.bf16 %v190_v37, %v863_v0 }
 0x176   :  { %v169_v39 = vpop.permute.xlu1 %168 }
 0x177   :  { %v179_v41 = vmax.f32 %v153_v27, %v169_v39  ;;  %825 = vrot.lane.b32.xlu1 %v824_v38, %s868_s25  ;;  %v804_v38 = vld [vmem:[%s1092_s5 + $0x58] sm:$0xff]  ;;  %v860_v39 = vld [vmem:[%s1090_s4] ss:$0 sm:$0xff] }
 0x178   :  { %541 = vmatpush.bf16.msra.mxu2 %v797_v34 }
 0x179   :  { %v187_v42 = vadd.f32 %v859_v31, %v179_v41  ;;  %v795_v41 = vld [vmem:[%s1092_s5 + $0x10] sm:$0xff] }
 0x17b   :  { %v191_v44 = vmax.f32 %v187_v42, 0.0  ;;  %v803_v42 = vld [vmem:[%s1092_s5 + $0x50] sm:$0xff] }
 0x17d   :  { %v834_v45 = vpack.i.bf16 %v192_v43, %v191_v44  ;;  %v829_v46 = vpack.i.bf16 %v191_v44, %v190_v37  ;;  %v796_v37 = vld [vmem:[%s1092_s5 + $0x18] sm:$0xff] }
 0x17e   :  { %542 = vmatpush.bf16.msra.mxu2 %v796_v37 }
 0x17f   :  { %835 = vrot.lane.b32.xlu0 %v834_v45, %s868_s25  ;;  %830 = vrot.lane.b32.xlu2 %v829_v46, %s869_s2 }
 0x180   :  { %840 = vrot.lane.b32.xlu1 %v834_v45, %s868_s25 }
 0x182   :  { %543 = vmatpush.bf16.msra.mxu2 %v795_v41 }
 0x186   :  { %v173_v47 = vpop.permute.xlu0 %172 }
 0x187   :  { %v181_v48 = vmax.f32 %v159_v29, %v173_v47  ;;  %v808_v29 = vld [vmem:[%s1092_s5 + $0x78] sm:$0xff]  ;;  %v794_v47 = vld [vmem:[%s1092_s5 + $0x8] sm:$0xff] }
 0x188   :  { %551 = vmatpush.bf16.msra.mxu3 %v808_v29  ;;  %544 = vmatpush.bf16.msra.mxu2 %v794_v47 }
 0x189   :  { %v189_v49 = vadd.f32 %v859_v31, %v181_v48  ;;  %v807_v31 = vld [vmem:[%s1092_s5 + $0x70] sm:$0xff]  ;;  %v802_v48 = vld [vmem:[%s1092_s5 + $0x48] sm:$0xff] }
 0x18b   :  { %v193_v50 = vmax.f32 %v189_v49, 0.0 }
 0x18c   :  { %552 = vmatpush.bf16.msra.mxu3 %v807_v31 }
 0x18d   :  { %v849_v51 = vpack.i.bf16 0.0, %v193_v50  ;;  %v844_v52 = vpack.i.bf16 %v193_v50, %v192_v43 }
 0x18f   :  { %850 = vrot.lane.b32.xlu0 %v849_v51, %s868_s25  ;;  %845 = vrot.lane.b32.xlu2 %v844_v52, %s869_s2  ;;  %v793_v52 = vld [vmem:[%s1092_s5] sm:$0xff] }
 0x190   :  { %553 = vmatpush.bf16.msra.mxu3 %v806_v33  ;;  %545 = vmatpush.bf16.msra.mxu2 %v793_v52 }
 0x194   :  { %554 = vmatpush.bf16.msra.mxu3 %v805_v35 }
 0x198   :  { %555 = vmatpush.bf16.msra.mxu3 %v804_v38 }
 0x19c   :  { %556 = vmatpush.bf16.msra.mxu3 %v803_v42 }
 0x1a0   :  { %557 = vmatpush.bf16.msra.mxu3 %v802_v48 }
 0x1a4   :  { %558 = vmatpush.bf16.msra.mxu3 %v801_v53 }
 0x1d9   :  { %v831_v61 = vpop.permute.xlu2 %830 }
 0x1da   :  { %v833_v0 = vunpack.i.h.bf16 %v831_v61  ;;  %v832_v1 = vunpack.i.l.bf16 %v831_v61  ;;  %v811_v61 = vld [vmem:[%s1093_s7 + $0x10] sm:$0xff] }
 0x1db   :  { %639 = vmatpush.bf16.msrb.mxu0 %v811_v61 }
 0x1e9   :  { %v826_v60 = vpop.permute.xlu1 %825  ;;  %v846_v11 = vpop.permute.xlu2 %845 }
 0x1ea   :  { %v828_v62 = vunpack.i.h.bf16 %v826_v60  ;;  %v827_v63 = vunpack.i.l.bf16 %v826_v60  ;;  %v848_v14 = vunpack.i.h.bf16 %v846_v11  ;;  %v847_v15 = vunpack.i.l.bf16 %v846_v11  ;;  %v810_v11 = vld [vmem:[%s1093_s7 + $0x8] sm:$0xff] }
 0x1eb   :  { %640 = vmatpush.bf16.msrb.mxu0 %v810_v11 }
 0x1ec   :  { %v267_v5 = vsel %vm266_vm4, %v827_v63, %v832_v1  ;;  %v268_v6 = vsel %vm266_vm4, %v828_v62, %v833_v0 }
 0x1f1   :  { %v836_v2 = vpop.permute.xlu0 %835 }
 0x1f2   :  { %v838_v3 = vunpack.i.h.bf16 %v836_v2  ;;  %v837_v4 = vunpack.i.l.bf16 %v836_v2  ;;  %v841_v10 = vpop.permute.xlu1 %840 }
 0x1f3   :  { %v843_v12 = vunpack.i.h.bf16 %v841_v10  ;;  %v842_v13 = vunpack.i.l.bf16 %v841_v10 }
 0x1f4   :  { %v272_v7 = vsel %vm271_vm5, %v267_v5, %v837_v4  ;;  %v273_v8 = vsel %vm271_vm5, %v268_v6, %v838_v3 }
 0x1f5   :  { %v276_v9 = vpack.c.bf16 %v273_v8, %v272_v7  ;;  %v269_v19 = vsel %vm266_vm4, %v842_v13, %v847_v15  ;;  %v270_v20 = vsel %vm266_vm4, %v843_v12, %v848_v14  ;;  %v809_v12 = vld [vmem:[%s1093_s7] sm:$0xff] }
 0x1f6   :  { %641 = vmatpush.bf16.msrb.mxu0 %v809_v12  ;;  %v861_v13 = vld [vmem:[%s1091_s6] ss:$0 sm:$0xff] }
 0x1f7   :  { %350 = vmatmul.bf16.vlgmr.msra.gmra.mxu1 %v276_v9 }
 0x201   :  { %v851_v16 = vpop.permute.xlu0 %850 }
 0x202   :  { %v853_v17 = vunpack.i.h.bf16 %v851_v16  ;;  %v852_v18 = vunpack.i.l.bf16 %v851_v16 }
 0x204   :  { %v274_v21 = vsel %vm271_vm5, %v269_v19, %v852_v18  ;;  %v275_v22 = vsel %vm271_vm5, %v270_v20, %v853_v17 }
 0x205   :  { %v277_v23 = vpack.c.bf16 %v275_v22, %v274_v21  ;;  %v862_v22 = vld [vmem:[%s1094_s8] ss:$0 sm:$0xff] }
 0x207   :  { %355 = vmatmul.bf16.gmra.mxu1 %v277_v23 }
 0x274   :  { %v989_v24 = vpop.f32.mrf.mxu1 }
 0x275   :  { %365 = vrot.lane.b32.xlu0 %v989_v24, %s867_s0 }
 0x27c   :  { %v353_v25 = vpop.f32.mrf.mxu1 }
 0x27d   :  { %367 = vrot.lane.b32.xlu1 %v353_v25, %s867_s0 }
 0x284   :  { %v994_v26 = vpop.f32.mrf.mxu1 }
 0x285   :  { %369 = vrot.lane.b32.xlu1 %v994_v26, %s867_s0 }
 0x28c   :  { %v358_v27 = vpop.f32.mrf.mxu1 }
 0x28d   :  { %371 = vrot.lane.b32.xlu2 %v358_v27, %s867_s0 }
 0x2e7   :  { %v372_v36 = vpop.permute.xlu2 %371  ;;  %v366_v59 = vpop.permute.xlu0 %365 }
 0x2e8   :  { %v380_v40 = vmax.f32 %v358_v27, %v372_v36  ;;  %v377_v62 = vmax.f32 %v989_v24, %v366_v59 }
 0x2ea   :  { %v388_v44 = vadd.f32 %v860_v39, %v380_v40  ;;  %v385_v0 = vadd.f32 %v860_v39, %v377_v62 }
 0x2ec   :  { %v392_v49 = vmax.f32 %v388_v44, 0.0  ;;  %v389_v3 = vmax.f32 %v385_v0, 0.0 }
 0x2ef   :  { %v368_v43 = vpop.permute.xlu1 %367 }
 0x2f0   :  { %v378_v45 = vmax.f32 %v353_v25, %v368_v43 }
 0x2f2   :  { %v386_v46 = vadd.f32 %v860_v39, %v378_v45 }
 0x2f4   :  { %v390_v50 = vmax.f32 %v386_v46, 0.0 }
 0x2f6   :  { %v854_v51 = vpack.i.bf16 %v392_v49, %v390_v50 }
 0x2f7   :  { %v370_v60 = vpop.permute.xlu1 %369 }
 0x2f8   :  { %855 = vrot.lane.b32.xlu2 %v854_v51, %s867_s0  ;;  %v379_v63 = vmax.f32 %v994_v26, %v370_v60 }
 0x2fa   :  { %v387_v1 = vadd.f32 %v860_v39, %v379_v63 }
 0x2fc   :  { %v391_v4 = vmax.f32 %v387_v1, 0.0 }
 0x352   :  { %v856_v2 = vpop.permute.xlu2 %855 }
 0x353   :  { %v858_v5 = vunpack.i.h.bf16 %v856_v2  ;;  %v857_v6 = vunpack.i.l.bf16 %v856_v2 }
 0x355   :  { %v402_v7 = vsel %vm401_vm6, %v389_v3, %v857_v6  ;;  %v403_v8 = vsel %vm401_vm6, %v391_v4, %v858_v5 }
 0x356   :  { %v404_v9 = vpack.c.bf16 %v402_v7, %v402_v7  ;;  %v405_v10 = vpack.c.bf16 %v403_v8, %v403_v8 }
 0x358   :  { %546 = vmatmul.bf16.vlgmr.msra.gmra.mxu2 %v404_v9  ;;  %559 = vmatmul.bf16.vlgmr.msra.gmra.mxu3 %v405_v10 }
 0x3db   :  { %v547_v14 = vpop.f32.mrf.mxu2  ;;  %v560_v15 = vpop.f32.mrf.mxu3 }
 0x3dc   :  { %v548_v16 = vadd.f32 %v861_v13, %v547_v14 }
 0x3de   :  { %v561_v17 = vadd.f32 %v560_v15, %v548_v16 }
 0x3e0   :  { %v564_v18 = vmax.f32 %v561_v17, 0.0 }
 0x3e2   :  { %v565_v19 = vpack.c.bf16 %v564_v18, %v564_v18 }
 0x3e3   :  { %v549_v20 = vpop.f32.mrf.mxu2  ;;  %v562_v21 = vpop.f32.mrf.mxu3 }
 0x3e4   :  { %642 = vmatmul.bf16.vlgmr.msrb.gmra.mxu0 %v565_v19 }
 0x461   :  { %v643_v23 = vpop.f32.mrf.mxu0 }
 0x462   :  { %v644_v24 = vadd.f32 %v862_v22, %v643_v23 }
 0x464   :  { %647 = vst [vmem:[%s1095_s9] sm:$0xff] %v644_v24 }
 0x469   :  { %v645_v25 = vpop.f32.mrf.mxu0 }

</bundles_post_ra>
